<compile_context>
chip_gen: v5e
topology: v5e:2x2
jax: 0.10.0
libtpu: 0.0.40
codegen_flags: <defaults>
</compile_context>

<pallas_src>
import jax
import jax.numpy as jnp
from jax.experimental import pallas as pl
from jax.experimental.pallas import tpu as pltpu

HIDDEN = 512
OUT = 128
BN_EPS = 1e-5  # PyTorch BatchNorm1d default


def feat_kernel(x_ref, w1_ref, b1_ref, w2_ref, b2_ref, o_ref):
    # Linear 1 (BatchNorm already folded into w1/b1): bf16 x bf16 -> f32 on the MXU.
    h = jnp.dot(x_ref[...], w1_ref[...], preferred_element_type=jnp.float32)
    h = h + b1_ref[...]

    # ReLU in f32 on the VPU.  Dropout(flags['ldr']) is identity in eval mode.
    # TODO(synk): training-mode dropout (random mask) not implemented; eval semantics used.
    h = jnp.maximum(h, 0.0)

    # Linear 2, then Sigmoid via EUP exp + approx reciprocal (frees VALU slots).
    z = jnp.dot(h.astype(jnp.bfloat16), w2_ref[...],
                preferred_element_type=jnp.float32)
    z = z + b2_ref[...]
    o_ref[...] = pl.reciprocal(1.0 + jnp.exp(-z), approx=True)


def feat_module_forward(x, params, *, tile_n=1024):
    """x: [N, IE] f32.  params: raw (unfolded) module parameters, all f32."""
    N, IE = x.shape
    H = params["w1"].shape[1]
    O = params["w2"].shape[1]

    # ---- Fold eval-mode BatchNorm1d into the first Linear (exact in eval mode) ----
    scale = params["gamma"] * jax.lax.rsqrt(params["var"] + BN_EPS)   # [1, H]
    w1f = params["w1"] * scale                                        # [IE, H]
    b1f = (params["b1"] - params["mean"]) * scale + params["beta"]    # [1, H]

    # ---- Zero-pad the IE feature dim up to a full 128-lane multiple (lane-dense x) ----
    IE_pad = max(128, ((IE + 127) // 128) * 128)
    if IE_pad != IE:
        x = jnp.pad(x, ((0, 0), (0, IE_pad - IE)))
        w1f = jnp.pad(w1f, ((0, IE_pad - IE), (0, 0)))

    # ---- bf16 matmul operands (halves HBM traffic); biases / output stay f32 ----
    x_bf = x.astype(jnp.bfloat16)
    w1_bf = w1f.astype(jnp.bfloat16)
    w2_bf = params["w2"].astype(jnp.bfloat16)
    b2 = params["b2"]

    # ---- Batch tiling: big tiles amortize per-step overhead, but never exceed N ----
    tile_n = min(tile_n, ((N + 7) // 8) * 8)   # multiple of 8 sublanes
    grid = (pl.cdiv(N, tile_n),)

    cost = pl.CostEstimate(
        flops=int(2 * N * (IE_pad * H + H * O)),
        transcendentals=int(N * O),
        bytes_accessed=int(x_bf.size * 2 + w1_bf.size * 2 + w2_bf.size * 2
                           + b1f.size * 4 + b2.size * 4 + N * O * 4),
    )

    return pl.pallas_call(
        feat_kernel,
        out_shape=jax.ShapeDtypeStruct((N, O), jnp.float32),
        grid_spec=pltpu.PrefetchScalarGridSpec(
            num_scalar_prefetch=0,
            grid=grid,
            in_specs=[
                pl.BlockSpec((tile_n, IE_pad), lambda i: (i, 0)),  # x: tiled over batch
                pl.BlockSpec((IE_pad, H), lambda i: (0, 0)),       # w1: resident
                pl.BlockSpec((1, H), lambda i: (0, 0)),            # b1: resident
                pl.BlockSpec((H, O), lambda i: (0, 0)),            # w2: resident
                pl.BlockSpec((1, O), lambda i: (0, 0)),            # b2: resident
            ],
            out_specs=pl.BlockSpec((tile_n, O), lambda i: (i, 0)),
        ),
        compiler_params=pltpu.CompilerParams(
            dimension_semantics=("parallel",),   # shard batch loop across TCs (v7x)
        ),
        cost_estimate=cost,
    )(x_bf, w1_bf, b1f, w2_bf, b2)


def init_params(key, ie_dim, hidden=HIDDEN, out_dim=OUT):
    k1, k2, k3, k4, k5, k6 = jax.random.split(key, 6)
    lim1 = 1.0 / jnp.sqrt(ie_dim)
    lim2 = 1.0 / jnp.sqrt(hidden)
    return {
        "w1": jax.random.uniform(k1, (ie_dim, hidden), jnp.float32, -lim1, lim1),
        "b1": jax.random.uniform(k2, (1, hidden), jnp.float32, -lim1, lim1),
        "gamma": jnp.ones((1, hidden), jnp.float32),
        "beta": jnp.zeros((1, hidden), jnp.float32),
        "mean": 0.01 * jax.random.normal(k3, (1, hidden), jnp.float32),
        "var": jnp.ones((1, hidden), jnp.float32)
               + 0.01 * jax.random.uniform(k4, (1, hidden), jnp.float32),
        "w2": jax.random.uniform(k5, (hidden, out_dim), jnp.float32, -lim2, lim2),
        "b2": jax.random.uniform(k6, (1, out_dim), jnp.float32, -lim2, lim2),
    }


def reference_forward(x, p):
    """Pure-f32 reference matching the PyTorch module in eval mode."""
    h = x @ p["w1"] + p["b1"]
    h = (h - p["mean"]) * jax.lax.rsqrt(p["var"] + BN_EPS) * p["gamma"] + p["beta"]
    h = jnp.maximum(h, 0.0)
    o = h @ p["w2"] + p["b2"]
    return jax.nn.sigmoid(o)


if __name__ == "__main__":
    key = jax.random.PRNGKey(0)
    kx, kp = jax.random.split(key)

    N, IE_DIM = 32, 32          # small batch, small input-embedding dim
    x = jax.random.normal(kx, (N, IE_DIM), jnp.float32)
    params = init_params(kp, IE_DIM)

    out = feat_module_forward(x, params)
    out = jax.block_until_ready(out)

    ref = reference_forward(x, params)
    assert out.shape == (N, OUT)
    # bf16 matmul operands + approx reciprocal -> compare with a loosened tolerance.
    assert jnp.max(jnp.abs(out - ref)) < 2e-2

    print("KERNEL_OK")
</pallas_src>

<mosaic_0001>
module attributes {stable_mosaic.version = 11 : i64} {
  func.func @feat_kernel(%arg0: i32, %arg1: memref<32x128xbf16, #tpu.memory_space<vmem>>, %arg2: memref<128x512xbf16, #tpu.memory_space<vmem>>, %arg3: memref<1x512xf32, #tpu.memory_space<vmem>>, %arg4: memref<512x128xbf16, #tpu.memory_space<vmem>>, %arg5: memref<1x128xf32, #tpu.memory_space<vmem>>, %arg6: memref<32x128xf32, #tpu.memory_space<vmem>>) attributes {dimension_semantics = [#tpu.dimension_semantics<parallel>], iteration_bounds = array<i64: 1>, scalar_prefetch = 0 : i64, scratch_operands = 0 : i64, tpu.core_type = #tpu.core_type<tc>, window_params = [{transform_indices = @transform_0, window_bounds = array<i64: 32, 128>}, {pipeline_mode = #tpu.pipeline_mode<synchronous>, transform_indices = @transform_1, window_bounds = array<i64: 128, 512>}, {pipeline_mode = #tpu.pipeline_mode<synchronous>, transform_indices = @transform_2, window_bounds = array<i64: 1, 512>}, {pipeline_mode = #tpu.pipeline_mode<synchronous>, transform_indices = @transform_3, window_bounds = array<i64: 512, 128>}, {pipeline_mode = #tpu.pipeline_mode<synchronous>, transform_indices = @transform_4, window_bounds = array<i64: 1, 128>}, {transform_indices = @transform_5, window_bounds = array<i64: 32, 128>}]} {
    %c0 = arith.constant 0 : index
    %c0_0 = arith.constant 0 : index
    %0 = vector.load %arg1[%c0, %c0_0] : memref<32x128xbf16, #tpu.memory_space<vmem>>, vector<32x128xbf16>
    %c0_1 = arith.constant 0 : index
    %c0_2 = arith.constant 0 : index
    %1 = vector.load %arg2[%c0_1, %c0_2] : memref<128x512xbf16, #tpu.memory_space<vmem>>, vector<128x512xbf16>
    %cst = arith.constant dense<0.000000e+00> : vector<32x512xf32>
    %2 = tpu.matmul %0, %1, %cst {dimension_numbers = #tpu.dot_dimension_numbers<[1], [0], [0], [1], [0, 0, 1, 1], [], []>} : vector<32x128xbf16>, vector<128x512xbf16>, vector<32x512xf32> -> vector<32x512xf32>
    %c0_3 = arith.constant 0 : index
    %c0_4 = arith.constant 0 : index
    %3 = vector.load %arg3[%c0_3, %c0_4] : memref<1x512xf32, #tpu.memory_space<vmem>>, vector<1x512xf32>
    %4 = vector.broadcast %3 : vector<1x512xf32> to vector<32x512xf32>
    %5 = arith.addf %2, %4 : vector<32x512xf32>
    %cst_5 = arith.constant 0.000000e+00 : f32
    %6 = vector.broadcast %cst_5 : f32 to vector<32x512xf32>
    %7 = arith.maximumf %5, %6 : vector<32x512xf32>
    %8 = arith.truncf %7 : vector<32x512xf32> to vector<32x512xbf16>
    %c0_6 = arith.constant 0 : index
    %c0_7 = arith.constant 0 : index
    %9 = vector.load %arg4[%c0_6, %c0_7] : memref<512x128xbf16, #tpu.memory_space<vmem>>, vector<512x128xbf16>
    %cst_8 = arith.constant dense<0.000000e+00> : vector<32x128xf32>
    %10 = tpu.matmul %8, %9, %cst_8 {dimension_numbers = #tpu.dot_dimension_numbers<[1], [0], [0], [1], [0, 0, 1, 1], [], []>} : vector<32x512xbf16>, vector<512x128xbf16>, vector<32x128xf32> -> vector<32x128xf32>
    %c0_9 = arith.constant 0 : index
    %c0_10 = arith.constant 0 : index
    %11 = vector.load %arg5[%c0_9, %c0_10] : memref<1x128xf32, #tpu.memory_space<vmem>>, vector<1x128xf32>
    %12 = vector.broadcast %11 : vector<1x128xf32> to vector<32x128xf32>
    %13 = arith.addf %10, %12 : vector<32x128xf32>
    %cst_11 = arith.constant 0.000000e+00 : f32
    %14 = vector.broadcast %cst_11 : f32 to vector<32x128xf32>
    %15 = arith.subf %14, %13 : vector<32x128xf32>
    %16 = math.exp %15 : vector<32x128xf32>
    %cst_12 = arith.constant 1.000000e+00 : f32
    %17 = vector.broadcast %cst_12 : f32 to vector<32x128xf32>
    %18 = arith.addf %17, %16 : vector<32x128xf32>
    %19 = tpu.reciprocal %18 {approx = true} : vector<32x128xf32> -> vector<32x128xf32>
    %c0_13 = arith.constant 0 : index
    %c0_14 = arith.constant 0 : index
    %20 = vector.load %arg6[%c0_13, %c0_14] : memref<32x128xf32, #tpu.memory_space<vmem>>, vector<32x128xf32>
    tpu.vector_store %arg6[%c0_13, %c0_14], %19 {strides = array<i32>} : memref<32x128xf32, #tpu.memory_space<vmem>>, vector<32x128xf32>,
    return
  }
  func.func @transform_0(%arg0: i32) -> (i32, i32) {
    %c0_i32 = arith.constant 0 : i32
    %c0_i32_0 = arith.constant 0 : i32
    return %arg0, %c0_i32 : i32, i32
  }
  func.func @transform_1(%arg0: i32) -> (i32, i32) {
    %c0_i32 = arith.constant 0 : i32
    %c0_i32_0 = arith.constant 0 : i32
    %c0_i32_1 = arith.constant 0 : i32
    return %c0_i32, %c0_i32_0 : i32, i32
  }
  func.func @transform_2(%arg0: i32) -> (i32, i32) {
    %c0_i32 = arith.constant 0 : i32
    %c0_i32_0 = arith.constant 0 : i32
    %c0_i32_1 = arith.constant 0 : i32
    return %c0_i32, %c0_i32_0 : i32, i32
  }
  func.func @transform_3(%arg0: i32) -> (i32, i32) {
    %c0_i32 = arith.constant 0 : i32
    %c0_i32_0 = arith.constant 0 : i32
    %c0_i32_1 = arith.constant 0 : i32
    return %c0_i32, %c0_i32_0 : i32, i32
  }
  func.func @transform_4(%arg0: i32) -> (i32, i32) {
    %c0_i32 = arith.constant 0 : i32
    %c0_i32_0 = arith.constant 0 : i32
    %c0_i32_1 = arith.constant 0 : i32
    return %c0_i32, %c0_i32_0 : i32, i32
  }
  func.func @transform_5(%arg0: i32) -> (i32, i32) {
    %c0_i32 = arith.constant 0 : i32
    %c0_i32_0 = arith.constant 0 : i32
    return %arg0, %c0_i32 : i32, i32
  }
}

</mosaic_0001>

<bundles_post_ra>
// kernel: tpu_custom_call.1
= control target key start
LH: loop header
LB: loop body
LE: loop exit
PB: predicated region body
PF: predicated region fallthrough
CT: control target
= control target key end

     0   :  { %10 = vsyncpa [#allocation3], 0  ;;  %s1326_s0 = inlined_call_operand.hbm [shape: bf16[32,128], index: 0, kind: input, shape index: {}]   ;;  %s1327_s1 = inlined_call_operand.hbm [shape: bf16[128,512], index: 1, kind: input, shape index: {}]   ;;  %s1328_s2 = inlined_call_operand.hbm [shape: f32[1,512], index: 2, kind: input, shape index: {}]   ;;  %s1329_s3 = inlined_call_operand.hbm [shape: bf16[512,128], index: 3, kind: input, shape index: {}]   ;;  %s1330_s4 = inlined_call_operand.vmem [shape: f32[1,128], index: 4, kind: input, shape index: {}]   ;;  %s1331_s5 = inlined_call_operand.hbm [shape: f32[32,128], index: 5, kind: output, shape index: {}]  }
   0x1   :  { %11 = vsyncpa [#allocation6], 0 }
   0x2   :  { %12 = vsyncpa [#allocation9], 0  ;;  %s31_s20 = sshll.u32 %s1327_s1, 4  ;;  %s32_s20 = int_to_ptr.hbm [resolvable:$true] %s31_s20 }
   0x3   :  { %13 = vsyncpa [#allocation4], 0  ;;  %s1267_s21 = smov [#allocation5]   ;;  %s18_s25 = sshll.u32 %s1326_s0, 4  ;;  %s19_s25 = int_to_ptr.hbm [resolvable:$true] %s18_s25 }
   0x4   :  { %s33_s22 = sshll.u32 %s1267_s21, 4  ;;  %s1268_s26 = smov 256   ;;  %s34_s22 = int_to_ptr.vmem [resolvable:$true] %s33_s22 }
   0x5   :  { %s1269_s27 = smov 16   ;;  %s1270_s28 = smov [#allocation2]  }
   0x6   :  { %39 = dma.hbm_to_vmem [thread:$0]  %s32_s20, 4096, %s34_s22, [#allocation6], %s1268_s26, %s1268_s26, %s1269_s27  }
   0x7   :  { %s20_s29 = sshll.u32 %s1270_s28, 4  ;;  %s1271_s30 = smov 64   ;;  %s21_s29 = int_to_ptr.vmem [resolvable:$true] %s20_s29 }
   0x8   :  { %s1272_s6 = smov 4   ;;  %s45_s8 = sshll.u32 %s1328_s2, 4  ;;  %s46_s8 = int_to_ptr.hbm [resolvable:$true] %s45_s8 }
   0x9   :  { %26 = dma.hbm_to_vmem [thread:$0]  %s19_s25, 256, %s21_s29, [#allocation3], %s1271_s30, %s1271_s30, %s1272_s6  }
   0xa   :  { %s1273_s9 = smov [#allocation7]   ;;  %s55_s12 = sshll.u32 %s1329_s3, 4  ;;  %s56_s12 = int_to_ptr.hbm [resolvable:$true] %s55_s12 }
   0xb   :  { %s47_s10 = sshll.u32 %s1273_s9, 4  ;;  %s1274_s13 = smov [#allocation8]   ;;  %s48_s10 = int_to_ptr.vmem [resolvable:$true] %s47_s10 }
   0xc   :  { %50 = dma.hbm_to_vmem [thread:$0]  %s46_s8, 64, %s48_s10, [#allocation6]  }
   0xd   :  { %s57_s14 = sshll.u32 %s1274_s13, 4  ;;  %s58_s14 = int_to_ptr.vmem [resolvable:$true] %s57_s14 }
   0xe   :  { %63 = dma.hbm_to_vmem [thread:$0]  %s56_s12, 4096, %s58_s14, [#allocation9], %s1271_s30, %s1271_s30, %s1272_s6  }
   0xf   :  { %1259 = dma.done.wait [#allocation3], 256  }
  0x10   :  { %1260 = vsyncadd [#allocation3], 4294967040 }
  0x11   :  { %1261 = dma.done.wait [#allocation6], 4160  }
  0x12   :  { %1262 = vsyncadd [#allocation6], 4294963136 }
  0x13   :  { %1263 = dma.done.wait [#allocation9], 4096  }
  0x14   :  { %1264 = vsyncadd [#allocation9], 4294963200  ;;  %v903_v0 = vld [vmem:[#allocation5 + $0xe0] sm:$0xf]  ;;  %v1077_v1 = vld [vmem:[#allocation5 + $0xec] sm:$0xf0] }
  0x15   :  { %v1075_v2 = vld [vmem:[#allocation5 + $0xe4] sm:$0xf]  ;;  %v904_v3 = vor.u32 %v1077_v1, %v903_v0  ;;  %v905_v4 = vld [vmem:[#allocation5 + $0xf0] sm:$0xf0]  ;;  %v911_v5 = vld [vmem:[#allocation5 + $0xe8] sm:$0xf] }
  0x16   :  { %v1078_v6 = vld [vmem:[#allocation5 + $0xf4] sm:$0xf0]  ;;  %v908_v7 = vor.u32 %v1075_v2, %v905_v4  ;;  %v1076_v9 = vld [vmem:[#allocation5 + $0xec] sm:$0xf]  ;;  %v913_v10 = vld [vmem:[#allocation5 + $0xf8] sm:$0xf0] }
  0x17   :  { %v912_v8 = vor.u32 %v1078_v6, %v911_v5  ;;  %v887_v11 = vld [vmem:[#allocation5 + $0xc0] sm:$0xf]  ;;  %300 = vmatpush.bf16.msra.mxu0 %v904_v3  ;;  %v916_v12 = vor.u32 %v1076_v9, %v913_v10  ;;  %v1073_v13 = vld [vmem:[#allocation5 + $0xcc] sm:$0xf0]  ;;  %v1071_v14 = vld [vmem:[#allocation5 + $0xc4] sm:$0xf] }
  0x18   :  { %v889_v15 = vld [vmem:[#allocation5 + $0xd0] sm:$0xf0]  ;;  %319 = vmatpush.bf16.msra.mxu1 %v908_v7  ;;  %v888_v16 = vor.u32 %v1073_v13, %v887_v11  ;;  %v895_v18 = vld [vmem:[#allocation5 + $0xc8] sm:$0xf]  ;;  %v1074_v19 = vld [vmem:[#allocation5 + $0xd4] sm:$0xf0] }
  0x19   :  { %338 = vmatpush.bf16.msra.mxu2 %v912_v8  ;;  %v892_v17 = vor.u32 %v1071_v14, %v889_v15  ;;  %v1072_v20 = vld [vmem:[#allocation5 + $0xcc] sm:$0xf]  ;;  %357 = vmatpush.bf16.msra.mxu3 %v916_v12  ;;  %v896_v21 = vor.u32 %v1074_v19, %v895_v18  ;;  %v897_v22 = vld [vmem:[#allocation5 + $0xd8] sm:$0xf0]  ;;  %v871_v23 = vld [vmem:[#allocation5 + $0xa0] sm:$0xf] }
  0x1a   :  { %v1069_v24 = vld [vmem:[#allocation5 + $0xac] sm:$0xf0]  ;;  %v900_v25 = vor.u32 %v1072_v20, %v897_v22  ;;  %v1067_v26 = vld [vmem:[#allocation5 + $0xa4] sm:$0xf]  ;;  %v873_v27 = vld [vmem:[#allocation5 + $0xb0] sm:$0xf0] }
  0x1b   :  { %v879_v28 = vld [vmem:[#allocation5 + $0xa8] sm:$0xf]  ;;  %301 = vmatpush.bf16.msra.mxu0 %v888_v16  ;;  %v872_v29 = vor.u32 %v1069_v24, %v871_v23  ;;  %v1070_v30 = vld [vmem:[#allocation5 + $0xb4] sm:$0xf0]  ;;  %v1068_v31 = vld [vmem:[#allocation5 + $0xac] sm:$0xf]  ;;  %v876_v33 = vor.u32 %v1067_v26, %v873_v27 }
  0x1c   :  { %v881_v32 = vld [vmem:[#allocation5 + $0xb8] sm:$0xf0]  ;;  %320 = vmatpush.bf16.msra.mxu1 %v892_v17  ;;  %v880_v34 = vor.u32 %v1070_v30, %v879_v28  ;;  %v855_v35 = vld [vmem:[#allocation5 + $0x80] sm:$0xf]  ;;  %v1065_v36 = vld [vmem:[#allocation5 + $0x8c] sm:$0xf0] }
  0x1d   :  { %339 = vmatpush.bf16.msra.mxu2 %v896_v21  ;;  %v1063_v37 = vld [vmem:[#allocation5 + $0x84] sm:$0xf]  ;;  %358 = vmatpush.bf16.msra.mxu3 %v900_v25  ;;  %v884_v38 = vor.u32 %v1068_v31, %v881_v32  ;;  %v857_v39 = vld [vmem:[#allocation5 + $0x90] sm:$0xf0]  ;;  %v863_v40 = vld [vmem:[#allocation5 + $0x88] sm:$0xf]  ;;  %v856_v44 = vor.u32 %v1065_v36, %v855_v35 }
  0x1e   :  { %v1066_v41 = vld [vmem:[#allocation5 + $0x94] sm:$0xf0]  ;;  %v1064_v42 = vld [vmem:[#allocation5 + $0x8c] sm:$0xf]  ;;  %v865_v43 = vld [vmem:[#allocation5 + $0x98] sm:$0xf0]  ;;  %v860_v45 = vor.u32 %v1063_v37, %v857_v39 }
  0x1f   :  { %302 = vmatpush.bf16.msra.mxu0 %v872_v29  ;;  %v864_v46 = vor.u32 %v1066_v41, %v863_v40  ;;  %v839_v47 = vld [vmem:[#allocation5 + $0x60] sm:$0xf]  ;;  %v1061_v48 = vld [vmem:[#allocation5 + $0x6c] sm:$0xf0]  ;;  %v1059_v49 = vld [vmem:[#allocation5 + $0x64] sm:$0xf]  ;;  %v868_v50 = vor.u32 %v1064_v42, %v865_v43 }
  0x20   :  { %321 = vmatpush.bf16.msra.mxu1 %v876_v33  ;;  %v841_v51 = vld [vmem:[#allocation5 + $0x70] sm:$0xf0]  ;;  %v847_v52 = vld [vmem:[#allocation5 + $0x68] sm:$0xf]  ;;  %v1062_v53 = vld [vmem:[#allocation5 + $0x74] sm:$0xf0]  ;;  %v840_v56 = vor.u32 %v1061_v48, %v839_v47 }
  0x21   :  { %340 = vmatpush.bf16.msra.mxu2 %v880_v34  ;;  %359 = vmatpush.bf16.msra.mxu3 %v884_v38  ;;  %v1060_v54 = vld [vmem:[#allocation5 + $0x6c] sm:$0xf]  ;;  %v849_v55 = vld [vmem:[#allocation5 + $0x78] sm:$0xf0]  ;;  %v844_v57 = vor.u32 %v1059_v49, %v841_v51  ;;  %v848_v58 = vor.u32 %v1062_v53, %v847_v52  ;;  %v823_v59 = vld [vmem:[#allocation5 + $0x40] sm:$0xf] }
  0x22   :  { %v1057_v60 = vld [vmem:[#allocation5 + $0x4c] sm:$0xf0]  ;;  %v1055_v61 = vld [vmem:[#allocation5 + $0x44] sm:$0xf]  ;;  %v852_v62 = vor.u32 %v1060_v54, %v849_v55  ;;  %v825_v63 = vld [vmem:[#allocation5 + $0x50] sm:$0xf0] }
  0x23   :  { %303 = vmatpush.bf16.msra.mxu0 %v856_v44  ;;  %v831_v0 = vld [vmem:[#allocation5 + $0x48] sm:$0xf]  ;;  %v1058_v1 = vld [vmem:[#allocation5 + $0x54] sm:$0xf0]  ;;  %v1056_v2 = vld [vmem:[#allocation5 + $0x4c] sm:$0xf]  ;;  %v824_v4 = vor.u32 %v1057_v60, %v823_v59  ;;  %v828_v5 = vor.u32 %v1055_v61, %v825_v63 }
  0x24   :  { %322 = vmatpush.bf16.msra.mxu1 %v860_v45  ;;  %v833_v3 = vld [vmem:[#allocation5 + $0x58] sm:$0xf0]  ;;  %v832_v6 = vor.u32 %v1058_v1, %v831_v0  ;;  %v807_v7 = vld [vmem:[#allocation5 + $0x20] sm:$0xf]  ;;  %v1053_v8 = vld [vmem:[#allocation5 + $0x2c] sm:$0xf0] }
  0x25   :  { %341 = vmatpush.bf16.msra.mxu2 %v864_v46  ;;  %360 = vmatpush.bf16.msra.mxu3 %v868_v50  ;;  %v1051_v9 = vld [vmem:[#allocation5 + $0x24] sm:$0xf]  ;;  %v836_v10 = vor.u32 %v1056_v2, %v833_v3  ;;  %v809_v11 = vld [vmem:[#allocation5 + $0x30] sm:$0xf0]  ;;  %v815_v12 = vld [vmem:[#allocation5 + $0x28] sm:$0xf]  ;;  %v808_v16 = vor.u32 %v1053_v8, %v807_v7 }
  0x26   :  { %v1054_v13 = vld [vmem:[#allocation5 + $0x34] sm:$0xf0]  ;;  %v1052_v14 = vld [vmem:[#allocation5 + $0x2c] sm:$0xf]  ;;  %v817_v15 = vld [vmem:[#allocation5 + $0x38] sm:$0xf0]  ;;  %v812_v17 = vor.u32 %v1051_v9, %v809_v11 }
  0x27   :  { %304 = vmatpush.bf16.msra.mxu0 %v840_v56  ;;  %v816_v18 = vor.u32 %v1054_v13, %v815_v12  ;;  %v791_v19 = vld [vmem:[#allocation5] sm:$0xf]  ;;  %v1049_v20 = vld [vmem:[#allocation5 + $0xc] sm:$0xf0]  ;;  %v1047_v21 = vld [vmem:[#allocation5 + $0x4] sm:$0xf]  ;;  %v820_v22 = vor.u32 %v1052_v14, %v817_v15 }
  0x28   :  { %323 = vmatpush.bf16.msra.mxu1 %v844_v57  ;;  %v793_v23 = vld [vmem:[#allocation5 + $0x10] sm:$0xf0]  ;;  %v799_v24 = vld [vmem:[#allocation5 + $0x8] sm:$0xf]  ;;  %v1050_v25 = vld [vmem:[#allocation5 + $0x14] sm:$0xf0]  ;;  %v792_v28 = vor.u32 %v1049_v20, %v791_v19 }
  0x29   :  { %342 = vmatpush.bf16.msra.mxu2 %v848_v58  ;;  %361 = vmatpush.bf16.msra.mxu3 %v852_v62  ;;  %v1048_v26 = vld [vmem:[#allocation5 + $0xc] sm:$0xf]  ;;  %v801_v27 = vld [vmem:[#allocation5 + $0x18] sm:$0xf0]  ;;  %v796_v29 = vor.u32 %v1047_v21, %v793_v23  ;;  %v800_v30 = vor.u32 %v1050_v25, %v799_v24  ;;  %v1045_v33 = vld [vmem:[#allocation2] sm:$0xff]  ;;  %s766_s18 = sshll.u32 %s1331_s5, 4  ;;  %s767_s18 = int_to_ptr.hbm [resolvable:$true] %s766_s18 }
  0x2a   :  { %v804_v31 = vor.u32 %v1048_v26, %v801_v27  ;;  %v1086_v32 = vld [vmem:[#allocation8 + $0x38] sm:$0xff]  ;;  %v1085_v36 = vld [vmem:[#allocation8 + $0x30] sm:$0xff]  ;;  %v1084_v40 = vld [vmem:[#allocation8 + $0x28] sm:$0xff]  ;;  %s1276_s19 = smov 128   ;;  %s1277_s20 = smov 8  }
  0x2b   :  { %305 = vmatpush.bf16.msra.mxu0 %v824_v4  ;;  %v1094_v34 = vld [vmem:[#allocation8 + $0x78] sm:$0xff]  ;;  %v1093_v38 = vld [vmem:[#allocation8 + $0x70] sm:$0xff]  ;;  %v1092_v42 = vld [vmem:[#allocation8 + $0x68] sm:$0xff] }
  0x2c   :  { %324 = vmatpush.bf16.msra.mxu1 %v828_v5  ;;  %v1102_v35 = vld [vmem:[#allocation8 + $0xb8] sm:$0xff]  ;;  %v1101_v39 = vld [vmem:[#allocation8 + $0xb0] sm:$0xff]  ;;  %v1100_v43 = vld [vmem:[#allocation8 + $0xa8] sm:$0xff] }
  0x2d   :  { %343 = vmatpush.bf16.msra.mxu2 %v832_v6  ;;  %362 = vmatpush.bf16.msra.mxu3 %v836_v10  ;;  %v1110_v37 = vld [vmem:[#allocation8 + $0xf8] sm:$0xff]  ;;  %v1109_v41 = vld [vmem:[#allocation8 + $0xf0] sm:$0xff]  ;;  %v1083_v44 = vld [vmem:[#allocation8 + $0x20] sm:$0xff] }
  0x2e   :  { %v1108_v45 = vld [vmem:[#allocation8 + $0xe8] sm:$0xff]  ;;  %v1091_v46 = vld [vmem:[#allocation8 + $0x60] sm:$0xff]  ;;  %v1046_v47 = vld [vmem:[#allocation2 + $0x8] sm:$0xff] }
  0x2f   :  { %306 = vmatpush.bf16.msra.mxu0 %v808_v16  ;;  %v1082_v48 = vld [vmem:[#allocation8 + $0x18] sm:$0xff]  ;;  %v1099_v50 = vld [vmem:[#allocation8 + $0xa0] sm:$0xff]  ;;  %v1081_v52 = vld [vmem:[#allocation8 + $0x10] sm:$0xff] }
  0x30   :  { %325 = vmatpush.bf16.msra.mxu1 %v812_v17  ;;  %v1090_v49 = vld [vmem:[#allocation8 + $0x58] sm:$0xff]  ;;  %v1107_v51 = vld [vmem:[#allocation8 + $0xe0] sm:$0xff]  ;;  %v1089_v53 = vld [vmem:[#allocation8 + $0x50] sm:$0xff] }
  0x31   :  { %344 = vmatpush.bf16.msra.mxu2 %v816_v18  ;;  %363 = vmatpush.bf16.msra.mxu3 %v820_v22  ;;  %v1098_v54 = vld [vmem:[#allocation8 + $0x98] sm:$0xff]  ;;  %v1080_v56 = vld [vmem:[#allocation8 + $0x8] sm:$0xff]  ;;  %v1097_v58 = vld [vmem:[#allocation8 + $0x90] sm:$0xff] }
  0x32   :  { %v1106_v55 = vld [vmem:[#allocation8 + $0xd8] sm:$0xff]  ;;  %v1088_v57 = vld [vmem:[#allocation8 + $0x48] sm:$0xff]  ;;  %v1105_v59 = vld [vmem:[#allocation8 + $0xd0] sm:$0xff] }
  0x33   :  { %307 = vmatpush.bf16.msra.mxu0 %v792_v28  ;;  %v1079_v60 = vld [vmem:[#allocation8] sm:$0xff]  ;;  %v1096_v62 = vld [vmem:[#allocation8 + $0x88] sm:$0xff]  ;;  %v118_v2 = vld [vmem:[#allocation7] sm:$0xf] }
  0x34   :  { %326 = vmatpush.bf16.msra.mxu1 %v796_v29  ;;  %v1087_v61 = vld [vmem:[#allocation8 + $0x40] sm:$0xff]  ;;  %v1104_v63 = vld [vmem:[#allocation8 + $0xc8] sm:$0xff]  ;;  %v120_v4 = vperm.slane %v118_v2, 0  ;;  %v121_v6 = vperm.slane %v118_v2, 1  ;;  %v122_v16 = vperm.slane %v118_v2, 2  ;;  %v123_v18 = vperm.slane %v118_v2, 3 }
  0x35   :  { %345 = vmatpush.bf16.msra.mxu2 %v800_v30  ;;  %364 = vmatpush.bf16.msra.mxu3 %v804_v31  ;;  %v1095_v0 = vld [vmem:[#allocation8 + $0x80] sm:$0xff] }
  0x36   :  { %308 = vmatmul.bf16.vlgmr.msra.gmra.mxu0 %v1045_v33  ;;  %v1103_v1 = vld [vmem:[#allocation8 + $0xc0] sm:$0xff] }
  0x37   :  { %660 = vmatpush.bf16.msrb.mxu0 %v1086_v32  ;;  %327 = vmatmul.bf16.vlgmr.msra.gmra.mxu1 %v1045_v33 }
  0x38   :  { %679 = vmatpush.bf16.msrb.mxu1 %v1094_v34  ;;  %346 = vmatmul.bf16.vlgmr.msra.gmra.mxu2 %v1045_v33 }
  0x39   :  { %365 = vmatmul.bf16.vlgmr.msra.gmra.mxu3 %v1045_v33  ;;  %698 = vmatpush.bf16.msrb.mxu2 %v1102_v35 }
  0x3a   :  { %717 = vmatpush.bf16.msrb.mxu3 %v1110_v37 }
  0x3b   :  { %661 = vmatpush.bf16.msrb.mxu0 %v1085_v36 }
  0x3c   :  { %680 = vmatpush.bf16.msrb.mxu1 %v1093_v38 }
  0x3d   :  { %699 = vmatpush.bf16.msrb.mxu2 %v1101_v39 }
  0x3e   :  { %718 = vmatpush.bf16.msrb.mxu3 %v1109_v41 }
  0x3f   :  { %662 = vmatpush.bf16.msrb.mxu0 %v1084_v40 }
  0x40   :  { %681 = vmatpush.bf16.msrb.mxu1 %v1092_v42 }
  0x41   :  { %700 = vmatpush.bf16.msrb.mxu2 %v1100_v43 }
  0x42   :  { %719 = vmatpush.bf16.msrb.mxu3 %v1108_v45 }
  0x43   :  { %663 = vmatpush.bf16.msrb.mxu0 %v1083_v44 }
  0x44   :  { %682 = vmatpush.bf16.msrb.mxu1 %v1091_v46 }
  0x45   :  { %701 = vmatpush.bf16.msrb.mxu2 %v1099_v50 }
  0x46   :  { %313 = vmatmul.bf16.gmra.mxu0 %v1046_v47  ;;  %720 = vmatpush.bf16.msrb.mxu3 %v1107_v51 }
  0x47   :  { %332 = vmatmul.bf16.gmra.mxu1 %v1046_v47  ;;  %664 = vmatpush.bf16.msrb.mxu0 %v1082_v48 }
  0x48   :  { %351 = vmatmul.bf16.gmra.mxu2 %v1046_v47  ;;  %683 = vmatpush.bf16.msrb.mxu1 %v1090_v49 }
  0x49   :  { %370 = vmatmul.bf16.gmra.mxu3 %v1046_v47  ;;  %702 = vmatpush.bf16.msrb.mxu2 %v1098_v54 }
  0x4a   :  { %721 = vmatpush.bf16.msrb.mxu3 %v1106_v55 }
  0x4b   :  { %665 = vmatpush.bf16.msrb.mxu0 %v1081_v52 }
  0x4c   :  { %684 = vmatpush.bf16.msrb.mxu1 %v1089_v53 }
  0x4d   :  { %703 = vmatpush.bf16.msrb.mxu2 %v1097_v58 }
  0x4e   :  { %722 = vmatpush.bf16.msrb.mxu3 %v1105_v59 }
  0x4f   :  { %666 = vmatpush.bf16.msrb.mxu0 %v1080_v56 }
  0x50   :  { %685 = vmatpush.bf16.msrb.mxu1 %v1088_v57 }
  0x51   :  { %704 = vmatpush.bf16.msrb.mxu2 %v1096_v62 }
  0x52   :  { %723 = vmatpush.bf16.msrb.mxu3 %v1104_v63 }
  0x53   :  { %667 = vmatpush.bf16.msrb.mxu0 %v1079_v60 }
  0x54   :  { %686 = vmatpush.bf16.msrb.mxu1 %v1087_v61 }
  0x55   :  { %705 = vmatpush.bf16.msrb.mxu2 %v1095_v0  ;;  %v1122_v0 = vld [vmem:[%s1330_s4] ss:$0 sm:$0xff]  ;;  %s1275_s4 = smov [#allocation10]  }
  0x56   :  { %724 = vmatpush.bf16.msrb.mxu3 %v1103_v1  ;;  %s764_s15 = sshll.u32 %s1275_s4, 4  ;;  %s765_s15 = int_to_ptr.vmem [resolvable:$true] %s764_s15 }
  0xb3   :  { %v309_v3 = vpop.f32.mrf.mxu0 }
  0xb4   :  { %v328_v5 = vpop.f32.mrf.mxu1  ;;  %v310_v7 = vadd.f32 %v309_v3, %v120_v4 }
  0xb5   :  { %v329_v8 = vadd.f32 %v328_v5, %v121_v6 }
  0xb6   :  { %v376_v12 = vmax.f32 %v310_v7, 0.0 }
  0xb7   :  { %v377_v15 = vmax.f32 %v329_v8, 0.0 }
  0xbb   :  { %v347_v9 = vpop.f32.mrf.mxu2  ;;  %v311_v11 = vpop.f32.mrf.mxu0 }
  0xbc   :  { %v366_v10 = vpop.f32.mrf.mxu3  ;;  %v312_v13 = vadd.f32 %v311_v11, %v120_v4  ;;  %v330_v14 = vpop.f32.mrf.mxu1  ;;  %v348_v22 = vadd.f32 %v347_v9, %v122_v16 }
  0xbd   :  { %v331_v17 = vadd.f32 %v330_v14, %v121_v6  ;;  %v367_v24 = vadd.f32 %v366_v10, %v123_v18 }
  0xbe   :  { %v380_v19 = vmax.f32 %v312_v13, 0.0  ;;  %v378_v31 = vmax.f32 %v348_v22, 0.0 }
  0xbf   :  { %v381_v20 = vmax.f32 %v331_v17, 0.0  ;;  %v379_v33 = vmax.f32 %v367_v24, 0.0 }
  0xc0   :  { %v392_v21 = vpack.c.bf16 %v380_v19, %v376_v12 }
  0xc1   :  { %v393_v23 = vpack.c.bf16 %v381_v20, %v377_v15 }
  0xc2   :  { %668 = vmatmul.bf16.vlgmr.msrb.gmra.mxu0 %v392_v21 }
  0xc3   :  { %v349_v25 = vpop.f32.mrf.mxu2  ;;  %687 = vmatmul.bf16.vlgmr.msrb.gmra.mxu1 %v393_v23  ;;  %v314_v28 = vpop.f32.mrf.mxu0 }
  0xc4   :  { %v350_v26 = vadd.f32 %v349_v25, %v122_v16  ;;  %v368_v27 = vpop.f32.mrf.mxu3  ;;  %v333_v30 = vpop.f32.mrf.mxu1  ;;  %v315_v37 = vadd.f32 %v314_v28, %v120_v4 }
  0xc5   :  { %v369_v29 = vadd.f32 %v368_v27, %v123_v18  ;;  %v334_v38 = vadd.f32 %v333_v30, %v121_v6 }
  0xc6   :  { %v382_v32 = vmax.f32 %v350_v26, 0.0  ;;  %v384_v42 = vmax.f32 %v315_v37, 0.0 }
  0xc7   :  { %v383_v34 = vmax.f32 %v369_v29, 0.0  ;;  %v385_v45 = vmax.f32 %v334_v38, 0.0 }
  0xc8   :  { %v394_v35 = vpack.c.bf16 %v382_v32, %v378_v31 }
  0xc9   :  { %v395_v36 = vpack.c.bf16 %v383_v34, %v379_v33 }
  0xca   :  { %706 = vmatmul.bf16.vlgmr.msrb.gmra.mxu2 %v394_v35 }
  0xcb   :  { %725 = vmatmul.bf16.vlgmr.msrb.gmra.mxu3 %v395_v36  ;;  %v352_v39 = vpop.f32.mrf.mxu2  ;;  %v316_v41 = vpop.f32.mrf.mxu0 }
  0xcc   :  { %v371_v40 = vpop.f32.mrf.mxu3  ;;  %v317_v43 = vadd.f32 %v316_v41, %v120_v4  ;;  %v335_v44 = vpop.f32.mrf.mxu1  ;;  %v353_v50 = vadd.f32 %v352_v39, %v122_v16 }
  0xcd   :  { %v336_v46 = vadd.f32 %v335_v44, %v121_v6  ;;  %v372_v52 = vadd.f32 %v371_v40, %v123_v18 }
  0xce   :  { %v388_v47 = vmax.f32 %v317_v43, 0.0  ;;  %v386_v57 = vmax.f32 %v353_v50, 0.0 }
  0xcf   :  { %v389_v48 = vmax.f32 %v336_v46, 0.0  ;;  %v387_v59 = vmax.f32 %v372_v52, 0.0 }
  0xd0   :  { %v396_v49 = vpack.c.bf16 %v388_v47, %v384_v42 }
  0xd1   :  { %v397_v51 = vpack.c.bf16 %v389_v48, %v385_v45 }
  0xd2   :  { %673 = vmatmul.bf16.gmra.mxu0 %v396_v49 }
  0xd3   :  { %v354_v53 = vpop.f32.mrf.mxu2  ;;  %692 = vmatmul.bf16.gmra.mxu1 %v397_v51 }
  0xd4   :  { %v355_v54 = vadd.f32 %v354_v53, %v122_v16  ;;  %v373_v55 = vpop.f32.mrf.mxu3 }
  0xd5   :  { %v374_v56 = vadd.f32 %v373_v55, %v123_v18 }
  0xd6   :  { %v390_v58 = vmax.f32 %v355_v54, 0.0 }
  0xd7   :  { %v391_v60 = vmax.f32 %v374_v56, 0.0 }
  0xd8   :  { %v398_v61 = vpack.c.bf16 %v390_v58, %v386_v57 }
  0xd9   :  { %v399_v62 = vpack.c.bf16 %v391_v60, %v387_v59 }
  0xda   :  { %711 = vmatmul.bf16.gmra.mxu2 %v398_v61 }
  0xdb   :  { %730 = vmatmul.bf16.gmra.mxu3 %v399_v62 }
 0x13f   :  { %v669_v63 = vpop.f32.mrf.mxu0 }
 0x140   :  { %v688_v1 = vpop.f32.mrf.mxu1  ;;  %v670_v2 = vadd.f32 %v1122_v0, %v669_v63 }
 0x142   :  { %v689_v4 = vadd.f32 %v688_v1, %v670_v2 }
 0x147   :  { %v671_v3 = vpop.f32.mrf.mxu0 }
 0x148   :  { %v690_v8 = vpop.f32.mrf.mxu1  ;;  %v672_v9 = vadd.f32 %v1122_v0, %v671_v3 }
 0x14a   :  { %v691_v13 = vadd.f32 %v690_v8, %v672_v9 }
 0x14d   :  { %v707_v5 = vpop.f32.mrf.mxu2 }
 0x14e   :  { %v708_v6 = vadd.f32 %v707_v5, %v689_v4  ;;  %v726_v7 = vpop.f32.mrf.mxu3 }
 0x14f   :  { %v674_v12 = vpop.f32.mrf.mxu0 }
 0x150   :  { %v727_v10 = vadd.f32 %v726_v7, %v708_v6  ;;  %v675_v18 = vadd.f32 %v1122_v0, %v674_v12  ;;  %v693_v20 = vpop.f32.mrf.mxu1 }
 0x152   :  { %v736_v11 = vsub.f32 0.0, %v727_v10  ;;  %v694_v23 = vadd.f32 %v693_v20, %v675_v18 }
 0x154   :  { %v740_v14 = vmul.f32 1.442695, %v736_v11 }
 0x155   :  { %v709_v15 = vpop.f32.mrf.mxu2 }
 0x156   :  { %1123 = vpow2.f32 %v740_v14  ;;  %v710_v16 = vadd.f32 %v709_v15, %v691_v13  ;;  %v728_v17 = vpop.f32.mrf.mxu3 }
 0x157   :  { %v676_v26 = vpop.f32.mrf.mxu0 }
 0x158   :  { %v729_v19 = vadd.f32 %v728_v17, %v710_v16  ;;  %v677_v30 = vadd.f32 %v1122_v0, %v676_v26  ;;  %v695_v33 = vpop.f32.mrf.mxu1 }
 0x15a   :  { %v737_v21 = vsub.f32 0.0, %v729_v19  ;;  %v696_v35 = vadd.f32 %v695_v33, %v677_v30 }
 0x15c   :  { %v1124_v22 = vpop.eup %1123  ;;  %v742_v24 = vmul.f32 1.442695, %v737_v21 }
 0x15d   :  { %v748_v25 = vadd.f32 1.0, %v1124_v22  ;;  %v712_v27 = vpop.f32.mrf.mxu2 }
 0x15e   :  { %1125 = vpow2.f32 %v742_v24  ;;  %v713_v28 = vadd.f32 %v712_v27, %v694_v23  ;;  %v731_v29 = vpop.f32.mrf.mxu3 }
 0x15f   :  { %1127 = vrcp.f32 %v748_v25 }
 0x160   :  { %v732_v31 = vadd.f32 %v731_v29, %v713_v28 }
 0x162   :  { %v738_v32 = vsub.f32 0.0, %v732_v31 }
 0x164   :  { %v1126_v34 = vpop.eup %1125  ;;  %v744_v36 = vmul.f32 1.442695, %v738_v32 }
 0x165   :  { %v1128_v37 = vpop.eup %1127  ;;  %v749_v38 = vadd.f32 1.0, %v1126_v34  ;;  %v714_v39 = vpop.f32.mrf.mxu2 }
 0x166   :  { %756 = vst [vmem:[#allocation10] sm:$0xff] %v1128_v37  ;;  %1129 = vpow2.f32 %v744_v36  ;;  %v715_v40 = vadd.f32 %v714_v39, %v696_v35  ;;  %v733_v41 = vpop.f32.mrf.mxu3 }
 0x167   :  { %1131 = vrcp.f32 %v749_v38 }
 0x168   :  { %v734_v42 = vadd.f32 %v733_v41, %v715_v40 }
 0x16a   :  { %v739_v43 = vsub.f32 0.0, %v734_v42 }
 0x16c   :  { %v1130_v44 = vpop.eup %1129  ;;  %v746_v45 = vmul.f32 1.442695, %v739_v43 }
 0x16d   :  { %v1132_v46 = vpop.eup %1131  ;;  %v750_v47 = vadd.f32 1.0, %v1130_v44 }
 0x16e   :  { %757 = vst [vmem:[#allocation10 + $0x8] sm:$0xff] %v1132_v46  ;;  %1133 = vpow2.f32 %v746_v45 }
 0x16f   :  { %1135 = vrcp.f32 %v750_v47 }
 0x174   :  { %v1134_v48 = vpop.eup %1133 }
 0x175   :  { %v1136_v49 = vpop.eup %1135  ;;  %v751_v50 = vadd.f32 1.0, %v1134_v48 }
 0x176   :  { %758 = vst [vmem:[#allocation10 + $0x10] sm:$0xff] %v1136_v49 }
 0x177   :  { %1137 = vrcp.f32 %v751_v50 }
 0x17d   :  { %v1138_v51 = vpop.eup %1137 }
 0x17e   :  { %759 = vst [vmem:[#allocation10 + $0x18] sm:$0xff] %v1138_v51 }
 0x17f   :  { %772 = dma.vmem_to_hbm [thread:$0]  %s765_s15, 512, %s767_s18, [#allocation4], %s1276_s19, %s1276_s19, %s1277_s20  }
 0x180   :  { %1265 = dma.done.wait [#allocation4], 512  }
 0x181   :  { %1266 = vsyncadd [#allocation4], 4294966784 }
 0x182   :  { %777 = vsyncpa [#allocation3], 1 }
 0x183   :  { %778 = vsyncpa [#allocation6], 1 }
 0x184   :  { %779 = vsyncpa [#allocation9], 1 }
 0x185   :  { %780 = vsyncpa [#allocation4], 1 }

</bundles_post_ra>
